<compile_context>
chip_gen: v5e
topology: v5e:2x2
jax: 0.10.0
libtpu: 0.0.40
codegen_flags: <defaults>
</compile_context>

<pallas_src>
import functools

import jax
import jax.numpy as jnp
from jax import lax
from jax.experimental import pallas as pl
from jax.experimental.pallas import tpu as pltpu


# ----------------------------- projection kernels --------------------------- #

def _linear_kernel(x_ref, w_ref, o_ref):
    # x_ref: (tm, K) bf16, w_ref: (K, tn) bf16, o_ref: (tm, tn)
    o_ref[...] = jnp.dot(x_ref[...], w_ref[...],
                         preferred_element_type=jnp.float32).astype(o_ref.dtype)


def _linear_bias_kernel(x_ref, w_ref, b_ref, o_ref):
    # b_ref: (1, tn) f32 — added to the f32 accumulator before the final cast.
    acc = jnp.dot(x_ref[...], w_ref[...], preferred_element_type=jnp.float32)
    o_ref[...] = (acc + b_ref[...]).astype(o_ref.dtype)


def _tiled_linear(x, w, b=None, *, out_dtype=None, tm=512, tn=512,
                  weight_resident_bytes=8 << 20):
    """y = x @ w (+ b).  x: (M, K), w: (K, N), b: (N,) f32 or None."""
    M, K = x.shape
    K2, N = w.shape
    assert K == K2
    out_dtype = out_dtype if out_dtype is not None else x.dtype

    tm = M if M <= tm else tm
    # Keep the whole weight resident in VMEM when it is ViT-sized (a few MiB);
    # otherwise tile N with a 128-multiple and keep the weight tile constant
    # across the inner M axis so it is fetched once per outer step.
    if w.size * w.dtype.itemsize <= weight_resident_bytes:
        tn = N
    else:
        tn = N if N <= tn else tn
    grid = (pl.cdiv(N, tn), pl.cdiv(M, tm))   # (j: N tiles outer, i: M tiles inner)

    x_spec = pl.BlockSpec((tm, K), lambda j, i: (i, 0))
    w_spec = pl.BlockSpec((K, tn), lambda j, i: (0, j))   # constant across inner i
    o_spec = pl.BlockSpec((tm, tn), lambda j, i: (i, j))

    in_itemsize = x.dtype.itemsize
    out_itemsize = jnp.dtype(out_dtype).itemsize
    block_bytes = (tm * K + K * tn) * in_itemsize + tm * tn * out_itemsize
    if b is not None:
        block_bytes += tn * 4
    # Double-buffered blocks + headroom; capped so v7x (64 MiB physical) is safe.
    vmem_limit = int(min(max(2 * block_bytes + (4 << 20), 32 << 20), 48 << 20))

    params = pltpu.CompilerParams(
        dimension_semantics=("parallel", "parallel"),
        vmem_limit_bytes=vmem_limit)
    cost = pl.CostEstimate(
        flops=2 * M * K * N,
        transcendentals=0,
        bytes_accessed=in_itemsize * (M * K + K * N) + out_itemsize * M * N)
    out_shape = jax.ShapeDtypeStruct((M, N), out_dtype)

    if b is None:
        return pl.pallas_call(
            _linear_kernel, out_shape=out_shape, grid=grid,
            in_specs=[x_spec, w_spec], out_specs=o_spec,
            compiler_params=params, cost_estimate=cost,
        )(x, w)

    b2d = b.reshape(1, N).astype(jnp.float32)
    b_spec = pl.BlockSpec((1, tn), lambda j, i: (0, j))
    return pl.pallas_call(
        _linear_bias_kernel, out_shape=out_shape, grid=grid,
        in_specs=[x_spec, w_spec, b_spec], out_specs=o_spec,
        compiler_params=params, cost_estimate=cost,
    )(x, w, b2d)


# ------------------------ fused multi-head flash attention ------------------ #

def _flash_mha_kernel(q_ref, k_ref, v_ref, o_ref, m_ref, l_ref, acc_ref, *,
                      heads, dim_head, scale, seq_len, mask_kv):
    # q_ref: (tq, inner) bf16   k_ref/v_ref: (tkv, inner) bf16
    # o_ref: (tq, inner) bf16 (lane-dense HBM writeback)
    # m_ref/l_ref: (H, tq, 1) f32   acc_ref: (H, tq, D) f32
    kv_i = pl.program_id(2)
    tq = q_ref.shape[0]
    tkv = k_ref.shape[0]

    @pl.when(kv_i == 0)
    def _init():
        m_ref[...] = jnp.full(m_ref.shape, -jnp.inf, dtype=m_ref.dtype)
        l_ref[...] = jnp.zeros(l_ref.shape, dtype=l_ref.dtype)
        acc_ref[...] = jnp.zeros(acc_ref.shape, dtype=acc_ref.dtype)

    if mask_kv:
        col = kv_i * tkv + lax.broadcasted_iota(jnp.int32, (tq, tkv), 1)
        valid = col < seq_len

    for h in range(heads):
        sl = slice(h * dim_head, (h + 1) * dim_head)
        q = q_ref[:, sl] * scale                      # scale folded into q (N*D mults)
        k = k_ref[:, sl]
        s = lax.dot_general(q, k, (((1,), (1,)), ((), ())),
                            preferred_element_type=jnp.float32)   # (tq, tkv) f32
        if mask_kv:
            s = jnp.where(valid, s, -jnp.inf)

        m_prev = m_ref[h]                                           # (tq, 1)
        m_next = jnp.maximum(m_prev, jnp.max(s, axis=-1, keepdims=True))
        alpha = jnp.exp(m_prev - m_next)
        p = jnp.exp(s - m_next)                                     # unnormalized
        l_ref[h] = alpha * l_ref[h] + jnp.sum(p, axis=-1, keepdims=True)
        acc_ref[h] = alpha * acc_ref[h] + lax.dot_general(
            p.astype(v_ref.dtype), v_ref[:, sl], (((1,), (0,)), ((), ())),
            preferred_element_type=jnp.float32)
        m_ref[h] = m_next

    @pl.when(kv_i == pl.num_programs(2) - 1)
    def _finalize():
        for h in range(heads):
            sl = slice(h * dim_head, (h + 1) * dim_head)
            inv_l = pl.reciprocal(l_ref[h], approx=True)            # EUP, ~free
            o_ref[:, sl] = (acc_ref[h] * inv_l).astype(o_ref.dtype)


def _flash_mha(qkv, *, heads, dim_head, scale, block_q=256, block_kv=256):
    """qkv: (B, N, 3*inner) bf16 -> (B, N, inner) bf16, no transposes needed."""
    B, N, three_inner = qkv.shape
    inner = heads * dim_head
    assert three_inner == 3 * inner
    assert inner % 128 == 0, "heads*dim_head must be a multiple of 128"

    tq = min(block_q, N)
    tkv = min(block_kv, N)
    grid = (B, pl.cdiv(N, tq), pl.cdiv(N, tkv))       # KV axis last (reduction)
    mask_kv = (N % tkv) != 0

    # Head split / q-k-v split fused into the BlockSpecs (column blocks of qkv).
    q_spec = pl.BlockSpec((None, tq, inner), lambda b, i, j: (b, i, 0))
    k_spec = pl.BlockSpec((None, tkv, inner), lambda b, i, j: (b, j, 1))
    v_spec = pl.BlockSpec((None, tkv, inner), lambda b, i, j: (b, j, 2))
    o_spec = pl.BlockSpec((None, tq, inner), lambda b, i, j: (b, i, 0))

    itemsize = qkv.dtype.itemsize
    block_bytes = (2 * tq + 2 * tkv) * inner * itemsize
    scratch_bytes = heads * tq * (dim_head + 2) * 4
    vmem_limit = int(min(max(2 * block_bytes + scratch_bytes + (8 << 20), 32 << 20),
                         48 << 20))

    kernel = functools.partial(
        _flash_mha_kernel, heads=heads, dim_head=dim_head, scale=scale,
        seq_len=N, mask_kv=mask_kv)

    cost = pl.CostEstimate(
        flops=4 * B * heads * N * N * dim_head,
        transcendentals=B * heads * N * N,
        bytes_accessed=itemsize * B * N * inner * (2 + 2 * pl.cdiv(N, tq)))

    return pl.pallas_call(
        kernel,
        out_shape=jax.ShapeDtypeStruct((B, N, inner), qkv.dtype),
        grid=grid,
        in_specs=[q_spec, k_spec, v_spec],
        out_specs=o_spec,
        scratch_shapes=[
            pltpu.VMEM((heads, tq, 1), jnp.float32),          # running max
            pltpu.VMEM((heads, tq, 1), jnp.float32),          # running sum
            pltpu.VMEM((heads, tq, dim_head), jnp.float32),   # output accumulator
        ],
        compiler_params=pltpu.CompilerParams(
            dimension_semantics=("parallel", "parallel", "arbitrary"),
            vmem_limit_bytes=vmem_limit),
        cost_estimate=cost,
    )(qkv, qkv, qkv)


# --------------------------------- wrapper ----------------------------------- #

@functools.partial(jax.jit, static_argnames=("heads", "dim_head"))
def attention_forward(x, w_qkv, w_out, b_out, *, heads, dim_head):
    """x: (B, N, dim); w_qkv: (dim, 3*inner); w_out: (inner, dim); b_out: (dim,)."""
    B, N, dim = x.shape
    inner = heads * dim_head
    scale = float(dim_head) ** -0.5
    out_dtype = x.dtype

    # bf16 at the kernel boundary (MXU-native); all accumulation stays f32.
    xb = x.astype(jnp.bfloat16)
    wq = w_qkv.astype(jnp.bfloat16)
    wo = w_out.astype(jnp.bfloat16)

    # 1) to_qkv (no bias): (B*N, dim) @ (dim, 3*inner) -> bf16.
    qkv = _tiled_linear(xb.reshape(B * N, dim), wq, out_dtype=jnp.bfloat16)
    qkv = qkv.reshape(B, N, 3 * inner)        # free reshape — no transposes anywhere

    # 2) fused multi-head flash attention -> lane-dense (B, N, inner) bf16.
    o = _flash_mha(qkv, heads=heads, dim_head=dim_head, scale=scale)

    # 3) to_out: Linear(inner, dim) + bias  (Dropout == identity in eval).
    out = _tiled_linear(o.reshape(B * N, inner), wo, b_out, out_dtype=out_dtype)
    return out.reshape(B, N, dim)


# ----------------------------------- main ------------------------------------ #

if __name__ == "__main__":
    # Small, deterministic config (overhead-dominated; correctness check only).
    # inner = heads*dim_head must be a multiple of 128 (true for real ViT sizes).
    B, N, dim = 2, 8, 32
    heads, dim_head = 2, 128
    inner = heads * dim_head          # 256 (project_out=True since dim != dim_head)

    key = jax.random.PRNGKey(0)
    kx, kq, ko, kb = jax.random.split(key, 4)
    x = jax.random.normal(kx, (B, N, dim), dtype=jnp.float32)
    w_qkv = jax.random.normal(kq, (dim, 3 * inner), dtype=jnp.float32) * 0.05
    w_out = jax.random.normal(ko, (inner, dim), dtype=jnp.float32) * 0.05
    b_out = jax.random.normal(kb, (dim,), dtype=jnp.float32) * 0.05

    out = attention_forward(x, w_qkv, w_out, b_out, heads=heads, dim_head=dim_head)
    out = jax.block_until_ready(out)

    # Pure-JAX reference (f32 math on the same bf16-rounded operands the kernels see).
    xb = x.astype(jnp.bfloat16).astype(jnp.float32)
    wqb = w_qkv.astype(jnp.bfloat16).astype(jnp.float32)
    wob = w_out.astype(jnp.bfloat16).astype(jnp.float32)
    scale = dim_head ** -0.5
    qkv_ref = xb @ wqb
    q_r, k_r, v_r = jnp.split(qkv_ref, 3, axis=-1)
    to_h = lambda t: t.reshape(B, N, heads, dim_head).transpose(0, 2, 1, 3)
    q_r, k_r, v_r = map(to_h, (q_r, k_r, v_r))
    dots = jnp.einsum("bhnd,bhmd->bhnm", q_r, k_r) * scale
    attn = jax.nn.softmax(dots, axis=-1)
    ref = jnp.einsum("bhnm,bhmd->bhnd", attn, v_r)
    ref = ref.transpose(0, 2, 1, 3).reshape(B, N, inner)
    ref = ref @ wob + b_out

    assert out.shape == (B, N, dim)
    err = float(jnp.max(jnp.abs(out - ref)))
    assert jnp.allclose(out, ref, atol=3e-2, rtol=3e-2), f"max abs err = {err}"

    print("KERNEL_OK")
</pallas_src>

<mosaic_0001>
module attributes {stable_mosaic.version = 11 : i64} {
  func.func @_linear_kernel(%arg0: i32, %arg1: i32, %arg2: memref<16x32xbf16, #tpu.memory_space<vmem>>, %arg3: memref<32x768xbf16, #tpu.memory_space<vmem>>, %arg4: memref<16x768xbf16, #tpu.memory_space<vmem>>) attributes {dimension_semantics = [#tpu.dimension_semantics<parallel>, #tpu.dimension_semantics<parallel>], iteration_bounds = array<i64: 1, 1>, scalar_prefetch = 0 : i64, scratch_operands = 0 : i64, tpu.core_type = #tpu.core_type<tc>, window_params = [{transform_indices = @transform_0, window_bounds = array<i64: 16, 32>}, {transform_indices = @transform_1, window_bounds = array<i64: 32, 768>}, {transform_indices = @transform_2, window_bounds = array<i64: 16, 768>}]} {
    %c0 = arith.constant 0 : index
    %c0_0 = arith.constant 0 : index
    %0 = vector.load %arg2[%c0, %c0_0] : memref<16x32xbf16, #tpu.memory_space<vmem>>, vector<16x32xbf16>
    %c0_1 = arith.constant 0 : index
    %c0_2 = arith.constant 0 : index
    %1 = vector.load %arg3[%c0_1, %c0_2] : memref<32x768xbf16, #tpu.memory_space<vmem>>, vector<32x768xbf16>
    %cst = arith.constant dense<0.000000e+00> : vector<16x768xf32>
    %2 = tpu.matmul %0, %1, %cst {dimension_numbers = #tpu.dot_dimension_numbers<[1], [0], [0], [1], [0, 0, 1, 1], [], []>} : vector<16x32xbf16>, vector<32x768xbf16>, vector<16x768xf32> -> vector<16x768xf32>
    %3 = arith.truncf %2 : vector<16x768xf32> to vector<16x768xbf16>
    %c0_3 = arith.constant 0 : index
    %c0_4 = arith.constant 0 : index
    %4 = vector.load %arg4[%c0_3, %c0_4] : memref<16x768xbf16, #tpu.memory_space<vmem>>, vector<16x768xbf16>
    tpu.vector_store %arg4[%c0_3, %c0_4], %3 {strides = array<i32>} : memref<16x768xbf16, #tpu.memory_space<vmem>>, vector<16x768xbf16>,
    return
  }
  func.func @transform_0(%arg0: i32, %arg1: i32) -> (i32, i32) {
    %c0_i32 = arith.constant 0 : i32
    %c0_i32_0 = arith.constant 0 : i32
    return %arg1, %c0_i32 : i32, i32
  }
  func.func @transform_1(%arg0: i32, %arg1: i32) -> (i32, i32) {
    %c0_i32 = arith.constant 0 : i32
    %c0_i32_0 = arith.constant 0 : i32
    return %c0_i32, %arg0 : i32, i32
  }
  func.func @transform_2(%arg0: i32, %arg1: i32) -> (i32, i32) {
    %c0_i32 = arith.constant 0 : i32
    return %arg1, %arg0 : i32, i32
  }
}

module attributes {stable_mosaic.version = 11 : i64} {
  func.func @_flash_mha_kernel(%arg0: i32, %arg1: i32, %arg2: i32, %arg3: memref<1x8x256xbf16, #tpu.memory_space<vmem>>, %arg4: memref<1x8x256xbf16, #tpu.memory_space<vmem>>, %arg5: memref<1x8x256xbf16, #tpu.memory_space<vmem>>, %arg6: memref<1x8x256xbf16, #tpu.memory_space<vmem>>, %arg7: memref<2x8x1xf32, #tpu.memory_space<vmem>>, %arg8: memref<2x8x1xf32, #tpu.memory_space<vmem>>, %arg9: memref<2x8x128xf32, #tpu.memory_space<vmem>>) attributes {dimension_semantics = [#tpu.dimension_semantics<parallel>, #tpu.dimension_semantics<parallel>, #tpu.dimension_semantics<arbitrary>], iteration_bounds = array<i64: 2, 1, 1>, scalar_prefetch = 0 : i64, scratch_operands = 3 : i64, tpu.core_type = #tpu.core_type<tc>, window_params = [{transform_indices = @transform_0, window_bounds = array<i64: 1, 8, 256>}, {transform_indices = @transform_1, window_bounds = array<i64: 1, 8, 256>}, {transform_indices = @transform_2, window_bounds = array<i64: 1, 8, 256>}, {transform_indices = @transform_3, window_bounds = array<i64: 1, 8, 256>}]} {
    %c0_i32 = arith.constant 0 : i32
    %0 = arith.cmpi eq, %arg2, %c0_i32 : i32
    %1 = arith.extui %0 : i1 to i32
    %c0_i32_0 = arith.constant 0 : i32
    %2 = arith.cmpi ne, %1, %c0_i32_0 : i32
    scf.if %2 {
      %cst_63 = arith.constant 0xFF800000 : f32
      %88 = vector.broadcast %cst_63 : f32 to vector<2x8x1xf32>
      %c0_64 = arith.constant 0 : index
      %c0_65 = arith.constant 0 : index
      %c0_66 = arith.constant 0 : index
      %89 = vector.load %arg7[%c0_64, %c0_65, %c0_66] : memref<2x8x1xf32, #tpu.memory_space<vmem>>, vector<2x8x1xf32>
      tpu.vector_store %arg7[%c0_64, %c0_65, %c0_66], %88 {strides = array<i32>} : memref<2x8x1xf32, #tpu.memory_space<vmem>>, vector<2x8x1xf32>,
      %cst_67 = arith.constant 0.000000e+00 : f32
      %90 = vector.broadcast %cst_67 : f32 to vector<2x8x1xf32>
      %c0_68 = arith.constant 0 : index
      %c0_69 = arith.constant 0 : index
      %c0_70 = arith.constant 0 : index
      %91 = vector.load %arg8[%c0_68, %c0_69, %c0_70] : memref<2x8x1xf32, #tpu.memory_space<vmem>>, vector<2x8x1xf32>
      tpu.vector_store %arg8[%c0_68, %c0_69, %c0_70], %90 {strides = array<i32>} : memref<2x8x1xf32, #tpu.memory_space<vmem>>, vector<2x8x1xf32>,
      %cst_71 = arith.constant 0.000000e+00 : f32
      %92 = vector.broadcast %cst_71 : f32 to vector<2x8x128xf32>
      %c0_72 = arith.constant 0 : index
      %c0_73 = arith.constant 0 : index
      %c0_74 = arith.constant 0 : index
      %93 = vector.load %arg9[%c0_72, %c0_73, %c0_74] : memref<2x8x128xf32, #tpu.memory_space<vmem>>, vector<2x8x128xf32>
      tpu.vector_store %arg9[%c0_72, %c0_73, %c0_74], %92 {strides = array<i32>} : memref<2x8x128xf32, #tpu.memory_space<vmem>>, vector<2x8x128xf32>,
    } else {
    }
    %c0 = arith.constant 0 : index
    %c0_1 = arith.constant 0 : index
    %c0_2 = arith.constant 0 : index
    %3 = vector.load %arg3[%c0, %c0_1, %c0_2] : memref<1x8x256xbf16, #tpu.memory_space<vmem>>, vector<1x8x128xbf16>
    %4 = vector.shape_cast %3 : vector<1x8x128xbf16> to vector<8x128xbf16>
    %cst = arith.constant 8.837890e-02 : bf16
    %5 = vector.broadcast %cst : bf16 to vector<8x128xbf16>
    %6 = arith.mulf %4, %5 : vector<8x128xbf16>
    %c0_3 = arith.constant 0 : index
    %c0_4 = arith.constant 0 : index
    %c0_5 = arith.constant 0 : index
    %7 = vector.load %arg4[%c0_3, %c0_4, %c0_5] : memref<1x8x256xbf16, #tpu.memory_space<vmem>>, vector<1x8x128xbf16>
    %8 = vector.shape_cast %7 : vector<1x8x128xbf16> to vector<8x128xbf16>
    %cst_6 = arith.constant dense<0.000000e+00> : vector<8x8xf32>
    %9 = tpu.matmul %6, %8, %cst_6 {dimension_numbers = #tpu.dot_dimension_numbers<[1], [1], [0], [0], [0, 0, 1, 0], [], []>} : vector<8x128xbf16>, vector<8x128xbf16>, vector<8x8xf32> -> vector<8x8xf32>
    %c0_7 = arith.constant 0 : index
    %c0_8 = arith.constant 0 : index
    %c0_9 = arith.constant 0 : index
    %10 = vector.load %arg7[%c0_7, %c0_8, %c0_9] : memref<2x8x1xf32, #tpu.memory_space<vmem>>, vector<1x8x1xf32>
    %11 = vector.shape_cast %10 : vector<1x8x1xf32> to vector<8x1xf32>
    %cst_10 = arith.constant dense<0xFF800000> : vector<8xf32>
    %12 = vector.multi_reduction <maximumf>, %9, %cst_10 [1] : vector<8x8xf32> to vector<8xf32>
    %13 = vector.shape_cast %12 : vector<8xf32> to vector<8x1xf32>
    %14 = arith.maximumf %11, %13 : vector<8x1xf32>
    %15 = arith.subf %11, %14 : vector<8x1xf32>
    %16 = math.exp %15 : vector<8x1xf32>
    %17 = vector.broadcast %14 : vector<8x1xf32> to vector<8x8xf32>
    %18 = arith.subf %9, %17 : vector<8x8xf32>
    %19 = math.exp %18 : vector<8x8xf32>
    %c0_11 = arith.constant 0 : index
    %c0_12 = arith.constant 0 : index
    %c0_13 = arith.constant 0 : index
    %20 = vector.load %arg8[%c0_11, %c0_12, %c0_13] : memref<2x8x1xf32, #tpu.memory_space<vmem>>, vector<1x8x1xf32>
    %21 = vector.shape_cast %20 : vector<1x8x1xf32> to vector<8x1xf32>
    %22 = arith.mulf %16, %21 : vector<8x1xf32>
    %cst_14 = arith.constant dense<0.000000e+00> : vector<8xf32>
    %23 = vector.multi_reduction <add>, %19, %cst_14 [1] : vector<8x8xf32> to vector<8xf32>
    %24 = vector.shape_cast %23 : vector<8xf32> to vector<8x1xf32>
    %25 = arith.addf %22, %24 : vector<8x1xf32>
    %c0_15 = arith.constant 0 : index
    %c0_16 = arith.constant 0 : index
    %c0_17 = arith.constant 0 : index
    %26 = vector.load %arg8[%c0_15, %c0_16, %c0_17] : memref<2x8x1xf32, #tpu.memory_space<vmem>>, vector<1x8x1xf32>
    %27 = vector.shape_cast %26 : vector<1x8x1xf32> to vector<8x1xf32>
    %28 = vector.shape_cast %25 : vector<8x1xf32> to vector<1x8x1xf32>
    tpu.vector_store %arg8[%c0_15, %c0_16, %c0_17], %28 {strides = array<i32>} : memref<2x8x1xf32, #tpu.memory_space<vmem>>, vector<1x8x1xf32>,
    %c0_18 = arith.constant 0 : index
    %c0_19 = arith.constant 0 : index
    %c0_20 = arith.constant 0 : index
    %29 = vector.load %arg9[%c0_18, %c0_19, %c0_20] : memref<2x8x128xf32, #tpu.memory_space<vmem>>, vector<1x8x128xf32>
    %30 = vector.shape_cast %29 : vector<1x8x128xf32> to vector<8x128xf32>
    %31 = vector.broadcast %16 : vector<8x1xf32> to vector<8x128xf32>
    %32 = arith.mulf %31, %30 : vector<8x128xf32>
    %33 = arith.truncf %19 : vector<8x8xf32> to vector<8x8xbf16>
    %c0_21 = arith.constant 0 : index
    %c0_22 = arith.constant 0 : index
    %c0_23 = arith.constant 0 : index
    %34 = vector.load %arg5[%c0_21, %c0_22, %c0_23] : memref<1x8x256xbf16, #tpu.memory_space<vmem>>, vector<1x8x128xbf16>
    %35 = vector.shape_cast %34 : vector<1x8x128xbf16> to vector<8x128xbf16>
    %cst_24 = arith.constant dense<0.000000e+00> : vector<8x128xf32>
    %36 = tpu.matmul %33, %35, %cst_24 {dimension_numbers = #tpu.dot_dimension_numbers<[1], [0], [0], [1], [0, 0, 1, 1], [], []>} : vector<8x8xbf16>, vector<8x128xbf16>, vector<8x128xf32> -> vector<8x128xf32>
    %37 = arith.addf %32, %36 : vector<8x128xf32>
    %c0_25 = arith.constant 0 : index
    %c0_26 = arith.constant 0 : index
    %c0_27 = arith.constant 0 : index
    %38 = vector.load %arg9[%c0_25, %c0_26, %c0_27] : memref<2x8x128xf32, #tpu.memory_space<vmem>>, vector<1x8x128xf32>
    %39 = vector.shape_cast %38 : vector<1x8x128xf32> to vector<8x128xf32>
    %40 = vector.shape_cast %37 : vector<8x128xf32> to vector<1x8x128xf32>
    tpu.vector_store %arg9[%c0_25, %c0_26, %c0_27], %40 {strides = array<i32>} : memref<2x8x128xf32, #tpu.memory_space<vmem>>, vector<1x8x128xf32>,
    %c0_28 = arith.constant 0 : index
    %c0_29 = arith.constant 0 : index
    %c0_30 = arith.constant 0 : index
    %41 = vector.load %arg7[%c0_28, %c0_29, %c0_30] : memref<2x8x1xf32, #tpu.memory_space<vmem>>, vector<1x8x1xf32>
    %42 = vector.shape_cast %41 : vector<1x8x1xf32> to vector<8x1xf32>
    %43 = vector.shape_cast %14 : vector<8x1xf32> to vector<1x8x1xf32>
    tpu.vector_store %arg7[%c0_28, %c0_29, %c0_30], %43 {strides = array<i32>} : memref<2x8x1xf32, #tpu.memory_space<vmem>>, vector<1x8x1xf32>,
    %c0_31 = arith.constant 0 : index
    %c0_32 = arith.constant 0 : index
    %c128 = arith.constant 128 : index
    %44 = vector.load %arg3[%c0_31, %c0_32, %c128] : memref<1x8x256xbf16, #tpu.memory_space<vmem>>, vector<1x8x128xbf16>
    %45 = vector.shape_cast %44 : vector<1x8x128xbf16> to vector<8x128xbf16>
    %cst_33 = arith.constant 8.837890e-02 : bf16
    %46 = vector.broadcast %cst_33 : bf16 to vector<8x128xbf16>
    %47 = arith.mulf %45, %46 : vector<8x128xbf16>
    %c0_34 = arith.constant 0 : index
    %c0_35 = arith.constant 0 : index
    %c128_36 = arith.constant 128 : index
    %48 = vector.load %arg4[%c0_34, %c0_35, %c128_36] : memref<1x8x256xbf16, #tpu.memory_space<vmem>>, vector<1x8x128xbf16>
    %49 = vector.shape_cast %48 : vector<1x8x128xbf16> to vector<8x128xbf16>
    %cst_37 = arith.constant dense<0.000000e+00> : vector<8x8xf32>
    %50 = tpu.matmul %47, %49, %cst_37 {dimension_numbers = #tpu.dot_dimension_numbers<[1], [1], [0], [0], [0, 0, 1, 0], [], []>} : vector<8x128xbf16>, vector<8x128xbf16>, vector<8x8xf32> -> vector<8x8xf32>
    %c1 = arith.constant 1 : index
    %c0_38 = arith.constant 0 : index
    %c0_39 = arith.constant 0 : index
    %51 = vector.load %arg7[%c1, %c0_38, %c0_39] : memref<2x8x1xf32, #tpu.memory_space<vmem>>, vector<1x8x1xf32>
    %52 = vector.shape_cast %51 : vector<1x8x1xf32> to vector<8x1xf32>
    %cst_40 = arith.constant dense<0xFF800000> : vector<8xf32>
    %53 = vector.multi_reduction <maximumf>, %50, %cst_40 [1] : vector<8x8xf32> to vector<8xf32>
    %54 = vector.shape_cast %53 : vector<8xf32> to vector<8x1xf32>
    %55 = arith.maximumf %52, %54 : vector<8x1xf32>
    %56 = arith.subf %52, %55 : vector<8x1xf32>
    %57 = math.exp %56 : vector<8x1xf32>
    %58 = vector.broadcast %55 : vector<8x1xf32> to vector<8x8xf32>
    %59 = arith.subf %50, %58 : vector<8x8xf32>
    %60 = math.exp %59 : vector<8x8xf32>
    %c1_41 = arith.constant 1 : index
    %c0_42 = arith.constant 0 : index
    %c0_43 = arith.constant 0 : index
    %61 = vector.load %arg8[%c1_41, %c0_42, %c0_43] : memref<2x8x1xf32, #tpu.memory_space<vmem>>, vector<1x8x1xf32>
    %62 = vector.shape_cast %61 : vector<1x8x1xf32> to vector<8x1xf32>
    %63 = arith.mulf %57, %62 : vector<8x1xf32>
    %cst_44 = arith.constant dense<0.000000e+00> : vector<8xf32>
    %64 = vector.multi_reduction <add>, %60, %cst_44 [1] : vector<8x8xf32> to vector<8xf32>
    %65 = vector.shape_cast %64 : vector<8xf32> to vector<8x1xf32>
    %66 = arith.addf %63, %65 : vector<8x1xf32>
    %c1_45 = arith.constant 1 : index
    %c0_46 = arith.constant 0 : index
    %c0_47 = arith.constant 0 : index
    %67 = vector.load %arg8[%c1_45, %c0_46, %c0_47] : memref<2x8x1xf32, #tpu.memory_space<vmem>>, vector<1x8x1xf32>
    %68 = vector.shape_cast %67 : vector<1x8x1xf32> to vector<8x1xf32>
    %69 = vector.shape_cast %66 : vector<8x1xf32> to vector<1x8x1xf32>
    tpu.vector_store %arg8[%c1_45, %c0_46, %c0_47], %69 {strides = array<i32>} : memref<2x8x1xf32, #tpu.memory_space<vmem>>, vector<1x8x1xf32>,
    %c1_48 = arith.constant 1 : index
    %c0_49 = arith.constant 0 : index
    %c0_50 = arith.constant 0 : index
    %70 = vector.load %arg9[%c1_48, %c0_49, %c0_50] : memref<2x8x128xf32, #tpu.memory_space<vmem>>, vector<1x8x128xf32>
    %71 = vector.shape_cast %70 : vector<1x8x128xf32> to vector<8x128xf32>
    %72 = vector.broadcast %57 : vector<8x1xf32> to vector<8x128xf32>
    %73 = arith.mulf %72, %71 : vector<8x128xf32>
    %74 = arith.truncf %60 : vector<8x8xf32> to vector<8x8xbf16>
    %c0_51 = arith.constant 0 : index
    %c0_52 = arith.constant 0 : index
    %c128_53 = arith.constant 128 : index
    %75 = vector.load %arg5[%c0_51, %c0_52, %c128_53] : memref<1x8x256xbf16, #tpu.memory_space<vmem>>, vector<1x8x128xbf16>
    %76 = vector.shape_cast %75 : vector<1x8x128xbf16> to vector<8x128xbf16>
    %cst_54 = arith.constant dense<0.000000e+00> : vector<8x128xf32>
    %77 = tpu.matmul %74, %76, %cst_54 {dimension_numbers = #tpu.dot_dimension_numbers<[1], [0], [0], [1], [0, 0, 1, 1], [], []>} : vector<8x8xbf16>, vector<8x128xbf16>, vector<8x128xf32> -> vector<8x128xf32>
    %78 = arith.addf %73, %77 : vector<8x128xf32>
    %c1_55 = arith.constant 1 : index
    %c0_56 = arith.constant 0 : index
    %c0_57 = arith.constant 0 : index
    %79 = vector.load %arg9[%c1_55, %c0_56, %c0_57] : memref<2x8x128xf32, #tpu.memory_space<vmem>>, vector<1x8x128xf32>
    %80 = vector.shape_cast %79 : vector<1x8x128xf32> to vector<8x128xf32>
    %81 = vector.shape_cast %78 : vector<8x128xf32> to vector<1x8x128xf32>
    tpu.vector_store %arg9[%c1_55, %c0_56, %c0_57], %81 {strides = array<i32>} : memref<2x8x128xf32, #tpu.memory_space<vmem>>, vector<1x8x128xf32>,
    %c1_58 = arith.constant 1 : index
    %c0_59 = arith.constant 0 : index
    %c0_60 = arith.constant 0 : index
    %82 = vector.load %arg7[%c1_58, %c0_59, %c0_60] : memref<2x8x1xf32, #tpu.memory_space<vmem>>, vector<1x8x1xf32>
    %83 = vector.shape_cast %82 : vector<1x8x1xf32> to vector<8x1xf32>
    %84 = vector.shape_cast %55 : vector<8x1xf32> to vector<1x8x1xf32>
    tpu.vector_store %arg7[%c1_58, %c0_59, %c0_60], %84 {strides = array<i32>} : memref<2x8x1xf32, #tpu.memory_space<vmem>>, vector<1x8x1xf32>,
    %c0_i32_61 = arith.constant 0 : i32
    %85 = arith.cmpi eq, %arg2, %c0_i32_61 : i32
    %86 = arith.extui %85 : i1 to i32
    %c0_i32_62 = arith.constant 0 : i32
    %87 = arith.cmpi ne, %86, %c0_i32_62 : i32
    scf.if %87 {
      %c0_63 = arith.constant 0 : index
      %c0_64 = arith.constant 0 : index
      %c0_65 = arith.constant 0 : index
      %88 = vector.load %arg8[%c0_63, %c0_64, %c0_65] : memref<2x8x1xf32, #tpu.memory_space<vmem>>, vector<1x8x1xf32>
      %89 = vector.shape_cast %88 : vector<1x8x1xf32> to vector<8x1xf32>
      %90 = tpu.reciprocal %89 {approx = true} : vector<8x1xf32> -> vector<8x1xf32>
      %c0_66 = arith.constant 0 : index
      %c0_67 = arith.constant 0 : index
      %c0_68 = arith.constant 0 : index
      %91 = vector.load %arg9[%c0_66, %c0_67, %c0_68] : memref<2x8x128xf32, #tpu.memory_space<vmem>>, vector<1x8x128xf32>
      %92 = vector.shape_cast %91 : vector<1x8x128xf32> to vector<8x128xf32>
      %93 = vector.broadcast %90 : vector<8x1xf32> to vector<8x128xf32>
      %94 = arith.mulf %92, %93 : vector<8x128xf32>
      %95 = arith.truncf %94 : vector<8x128xf32> to vector<8x128xbf16>
      %c0_69 = arith.constant 0 : index
      %c0_70 = arith.constant 0 : index
      %c0_71 = arith.constant 0 : index
      %96 = vector.load %arg6[%c0_69, %c0_70, %c0_71] : memref<1x8x256xbf16, #tpu.memory_space<vmem>>, vector<1x8x128xbf16>
      %97 = vector.shape_cast %96 : vector<1x8x128xbf16> to vector<8x128xbf16>
      %98 = vector.shape_cast %95 : vector<8x128xbf16> to vector<1x8x128xbf16>
      tpu.vector_store %arg6[%c0_69, %c0_70, %c0_71], %98 {strides = array<i32>} : memref<1x8x256xbf16, #tpu.memory_space<vmem>>, vector<1x8x128xbf16>,
      %c1_72 = arith.constant 1 : index
      %c0_73 = arith.constant 0 : index
      %c0_74 = arith.constant 0 : index
      %99 = vector.load %arg8[%c1_72, %c0_73, %c0_74] : memref<2x8x1xf32, #tpu.memory_space<vmem>>, vector<1x8x1xf32>
      %100 = vector.shape_cast %99 : vector<1x8x1xf32> to vector<8x1xf32>
      %101 = tpu.reciprocal %100 {approx = true} : vector<8x1xf32> -> vector<8x1xf32>
      %c1_75 = arith.constant 1 : index
      %c0_76 = arith.constant 0 : index
      %c0_77 = arith.constant 0 : index
      %102 = vector.load %arg9[%c1_75, %c0_76, %c0_77] : memref<2x8x128xf32, #tpu.memory_space<vmem>>, vector<1x8x128xf32>
      %103 = vector.shape_cast %102 : vector<1x8x128xf32> to vector<8x128xf32>
      %104 = vector.broadcast %101 : vector<8x1xf32> to vector<8x128xf32>
      %105 = arith.mulf %103, %104 : vector<8x128xf32>
      %106 = arith.truncf %105 : vector<8x128xf32> to vector<8x128xbf16>
      %c0_78 = arith.constant 0 : index
      %c0_79 = arith.constant 0 : index
      %c128_80 = arith.constant 128 : index
      %107 = vector.load %arg6[%c0_78, %c0_79, %c128_80] : memref<1x8x256xbf16, #tpu.memory_space<vmem>>, vector<1x8x128xbf16>
      %108 = vector.shape_cast %107 : vector<1x8x128xbf16> to vector<8x128xbf16>
      %109 = vector.shape_cast %106 : vector<8x128xbf16> to vector<1x8x128xbf16>
      tpu.vector_store %arg6[%c0_78, %c0_79, %c128_80], %109 {strides = array<i32>} : memref<1x8x256xbf16, #tpu.memory_space<vmem>>, vector<1x8x128xbf16>,
    } else {
    }
    return
  }
  func.func @transform_0(%arg0: i32, %arg1: i32, %arg2: i32) -> (i32, i32, i32) {
    %c0_i32 = arith.constant 0 : i32
    %c0_i32_0 = arith.constant 0 : i32
    return %arg0, %arg1, %c0_i32 : i32, i32, i32
  }
  func.func @transform_1(%arg0: i32, %arg1: i32, %arg2: i32) -> (i32, i32, i32) {
    %c1_i32 = arith.constant 1 : i32
    %c0_i32 = arith.constant 0 : i32
    return %arg0, %arg2, %c1_i32 : i32, i32, i32
  }
  func.func @transform_2(%arg0: i32, %arg1: i32, %arg2: i32) -> (i32, i32, i32) {
    %c2_i32 = arith.constant 2 : i32
    %c0_i32 = arith.constant 0 : i32
    return %arg0, %arg2, %c2_i32 : i32, i32, i32
  }
  func.func @transform_3(%arg0: i32, %arg1: i32, %arg2: i32) -> (i32, i32, i32) {
    %c0_i32 = arith.constant 0 : i32
    %c0_i32_0 = arith.constant 0 : i32
    return %arg0, %arg1, %c0_i32 : i32, i32, i32
  }
}

module attributes {stable_mosaic.version = 11 : i64} {
  func.func @_linear_bias_kernel(%arg0: i32, %arg1: i32, %arg2: memref<16x256xbf16, #tpu.memory_space<vmem>>, %arg3: memref<256x32xbf16, #tpu.memory_space<vmem>>, %arg4: memref<1x32xf32, #tpu.memory_space<vmem>>, %arg5: memref<16x32xf32, #tpu.memory_space<vmem>>) attributes {dimension_semantics = [#tpu.dimension_semantics<parallel>, #tpu.dimension_semantics<parallel>], iteration_bounds = array<i64: 1, 1>, scalar_prefetch = 0 : i64, scratch_operands = 0 : i64, tpu.core_type = #tpu.core_type<tc>, window_params = [{transform_indices = @transform_0, window_bounds = array<i64: 16, 256>}, {transform_indices = @transform_1, window_bounds = array<i64: 256, 32>}, {transform_indices = @transform_2, window_bounds = array<i64: 1, 32>}, {transform_indices = @transform_3, window_bounds = array<i64: 16, 32>}]} {
    %c0 = arith.constant 0 : index
    %c0_0 = arith.constant 0 : index
    %0 = vector.load %arg2[%c0, %c0_0] : memref<16x256xbf16, #tpu.memory_space<vmem>>, vector<16x256xbf16>
    %c0_1 = arith.constant 0 : index
    %c0_2 = arith.constant 0 : index
    %1 = vector.load %arg3[%c0_1, %c0_2] : memref<256x32xbf16, #tpu.memory_space<vmem>>, vector<256x32xbf16>
    %cst = arith.constant dense<0.000000e+00> : vector<16x32xf32>
    %2 = tpu.matmul %0, %1, %cst {dimension_numbers = #tpu.dot_dimension_numbers<[1], [0], [0], [1], [0, 0, 1, 1], [], []>} : vector<16x256xbf16>, vector<256x32xbf16>, vector<16x32xf32> -> vector<16x32xf32>
    %c0_3 = arith.constant 0 : index
    %c0_4 = arith.constant 0 : index
    %3 = vector.load %arg4[%c0_3, %c0_4] : memref<1x32xf32, #tpu.memory_space<vmem>>, vector<1x32xf32>
    %4 = vector.broadcast %3 : vector<1x32xf32> to vector<16x32xf32>
    %5 = arith.addf %2, %4 : vector<16x32xf32>
    %c0_5 = arith.constant 0 : index
    %c0_6 = arith.constant 0 : index
    %6 = vector.load %arg5[%c0_5, %c0_6] : memref<16x32xf32, #tpu.memory_space<vmem>>, vector<16x32xf32>
    tpu.vector_store %arg5[%c0_5, %c0_6], %5 {strides = array<i32>} : memref<16x32xf32, #tpu.memory_space<vmem>>, vector<16x32xf32>,
    return
  }
  func.func @transform_0(%arg0: i32, %arg1: i32) -> (i32, i32) {
    %c0_i32 = arith.constant 0 : i32
    %c0_i32_0 = arith.constant 0 : i32
    return %arg1, %c0_i32 : i32, i32
  }
  func.func @transform_1(%arg0: i32, %arg1: i32) -> (i32, i32) {
    %c0_i32 = arith.constant 0 : i32
    %c0_i32_0 = arith.constant 0 : i32
    return %c0_i32, %arg0 : i32, i32
  }
  func.func @transform_2(%arg0: i32, %arg1: i32) -> (i32, i32) {
    %c0_i32 = arith.constant 0 : i32
    %c0_i32_0 = arith.constant 0 : i32
    return %c0_i32, %arg0 : i32, i32
  }
  func.func @transform_3(%arg0: i32, %arg1: i32) -> (i32, i32) {
    %c0_i32 = arith.constant 0 : i32
    return %arg1, %arg0 : i32, i32
  }
}

</mosaic_0001>

<bundles_post_ra>
// kernel: attention_forward.5
= control target key start
LH: loop header
LB: loop body
LE: loop exit
PB: predicated region body
PF: predicated region fallthrough
CT: control target
= control target key end

     0   :  { %s417_s0 = inlined_call_operand.vmem [shape: bf16[16,256], index: 0, kind: input, shape index: {}]   ;;  %s418_s1 = inlined_call_operand.vmem [shape: bf16[256,32], index: 1, kind: input, shape index: {}]   ;;  %s419_s2 = inlined_call_operand.vmem [shape: f32[1,32], index: 2, kind: input, shape index: {}]   ;;  %s420_s3 = inlined_call_operand.hbm [shape: f32[16,32], index: 3, kind: output, shape index: {}]  }
   0x1   :  { %v289_v0 = vld [vmem:[%s418_s1 + $0x38] sm:$0xff]  ;;  %v288_v2 = vld [vmem:[%s418_s1 + $0x30] sm:$0xff]  ;;  %v287_v4 = vld [vmem:[%s418_s1 + $0x28] sm:$0xff] }
   0x2   :  { %v297_v1 = vld [vmem:[%s418_s1 + $0x78] sm:$0xff]  ;;  %159 = vmatpush.bf16.msra.mxu0 %v289_v0  ;;  %v296_v3 = vld [vmem:[%s418_s1 + $0x70] sm:$0xff]  ;;  %v295_v5 = vld [vmem:[%s418_s1 + $0x68] sm:$0xff] }
   0x3   :  { %173 = vmatpush.bf16.msra.mxu1 %v297_v1 }
   0x6   :  { %160 = vmatpush.bf16.msra.mxu0 %v288_v2 }
   0x7   :  { %174 = vmatpush.bf16.msra.mxu1 %v296_v3 }
   0x8   :  { %8 = vsyncpa [#allocation3], 0  ;;  %v286_v6 = vld [vmem:[%s418_s1 + $0x20] sm:$0xff]  ;;  %v285_v8 = vld [vmem:[%s418_s1 + $0x18] sm:$0xff]  ;;  %vm187_vm0 = vcmask 261120   ;;  %s328_s26 = smov [#allocation2]  }
   0x9   :  { %v294_v7 = vld [vmem:[%s418_s1 + $0x60] sm:$0xff]  ;;  %v293_v9 = vld [vmem:[%s418_s1 + $0x58] sm:$0xff]  ;;  %v284_v10 = vld [vmem:[%s418_s1 + $0x10] sm:$0xff]  ;;  %s194_s27 = sshll.u32 %s328_s26, 4  ;;  %s196_s29 = sshll.u32 %s420_s3, 4  ;;  %s195_s27 = int_to_ptr.vmem [resolvable:$true] %s194_s27  ;;  %s197_s29 = int_to_ptr.hbm [resolvable:$true] %s196_s29 }
   0xa   :  { %161 = vmatpush.bf16.msra.mxu0 %v287_v4  ;;  %v292_v11 = vld [vmem:[%s418_s1 + $0x50] sm:$0xff]  ;;  %v283_v12 = vld [vmem:[%s418_s1 + $0x8] sm:$0xff]  ;;  %v282_v14 = vld [vmem:[%s418_s1] sm:$0xff]  ;;  %s330_s30 = smov 8  }
   0xb   :  { %175 = vmatpush.bf16.msra.mxu1 %v295_v5  ;;  %v291_v13 = vld [vmem:[%s418_s1 + $0x48] sm:$0xff]  ;;  %v290_v15 = vld [vmem:[%s418_s1 + $0x40] sm:$0xff] }
   0xc   :  { %v210_v16 = vld [vmem:[%s417_s0] sm:$0xf]  ;;  %v281_v17 = vld [vmem:[%s417_s0 + $0x4] sm:$0xf0]  ;;  %v280_v18 = vld [vmem:[%s417_s0 + $0x4] sm:$0xf] }
   0xd   :  { %v212_v19 = vld [vmem:[%s417_s0 + $0x8] sm:$0xf0]  ;;  %v211_v20 = vor.u32 %v281_v17, %v210_v16  ;;  %v301_v22 = vld [vmem:[%s419_s2] ss:$0 sm:$0xff]  ;;  %s329_s2 = smov 128  }
   0xe   :  { %162 = vmatpush.bf16.msra.mxu0 %v286_v6  ;;  %v215_v21 = vor.u32 %v280_v18, %v212_v19 }
   0xf   :  { %176 = vmatpush.bf16.msra.mxu1 %v294_v7 }
  0x12   :  { %163 = vmatpush.bf16.msra.mxu0 %v285_v8 }
  0x13   :  { %177 = vmatpush.bf16.msra.mxu1 %v293_v9 }
  0x16   :  { %164 = vmatpush.bf16.msra.mxu0 %v284_v10 }
  0x17   :  { %178 = vmatpush.bf16.msra.mxu1 %v292_v11 }
  0x1a   :  { %165 = vmatpush.bf16.msra.mxu0 %v283_v12 }
  0x1b   :  { %179 = vmatpush.bf16.msra.mxu1 %v291_v13 }
  0x1e   :  { %166 = vmatpush.bf16.msra.mxu0 %v282_v14 }
  0x1f   :  { %180 = vmatpush.bf16.msra.mxu1 %v290_v15 }
  0x21   :  { %167 = vmatmul.bf16.vlgmr.msra.gmra.mxu0 %v211_v20 }
  0x22   :  { %181 = vmatmul.bf16.vlgmr.msra.gmra.mxu1 %v215_v21 }
  0x9e   :  { %v168_v23 = vpop.f32.mrf.mxu0 }
  0x9f   :  { %v182_v24 = vpop.f32.mrf.mxu1  ;;  %v169_v25 = vadd.f32 %v301_v22, %v168_v23 }
  0xa1   :  { %v183_v26 = vadd.f32 %v182_v24, %v169_v25 }
  0xa3   :  { %188 = vst.msk [vmem:[#allocation2] sm:$0xff] %vm187_vm0, %v183_v26 }
  0xa6   :  { %v170_v27 = vpop.f32.mrf.mxu0 }
  0xa7   :  { %v171_v28 = vadd.f32 %v301_v22, %v170_v27  ;;  %v184_v29 = vpop.f32.mrf.mxu1 }
  0xa9   :  { %v185_v30 = vadd.f32 %v184_v29, %v171_v28 }
  0xab   :  { %189 = vst.msk [vmem:[#allocation2 + $0x8] sm:$0xff] %vm187_vm0, %v185_v30 }
  0xac   :  { %202 = dma.vmem_to_hbm [thread:$0]  %s195_s27, 256, %s197_s29, [#allocation3], %s329_s2, %s329_s2, %s330_s30  }
  0xad   :  { %326 = dma.done.wait [#allocation3], 256  }
  0xae   :  { %327 = vsyncadd [#allocation3], 4294967040 }
  0xaf   :  { %207 = vsyncpa [#allocation3], 1 }

// kernel: attention_forward.3
= control target key start
LH: loop header
LB: loop body
LE: loop exit
PB: predicated region body
PF: predicated region fallthrough
CT: control target
= control target key end

     0   :  { %vm91_vm0 = vcmask 261120   ;;  %s380_s1 = inlined_call_operand.vmem [shape: bf16[32,768], index: 1, kind: input, shape index: {}]   ;;  %s381_s0 = inlined_call_operand.vmem [shape: bf16[16,32], index: 0, kind: input, shape index: {}]   ;;  %s382_s2 = inlined_call_operand.vmem [shape: bf16[16,768], index: 2, kind: output, shape index: {}]  }
   0x1   :  { %v225_v0 = vld [vmem:[%s380_s1 + $0x30] sm:$0xf]  ;;  %v263_v1 = vld [vmem:[%s380_s1 + $0x44] sm:$0xf0]  ;;  %v260_v2 = vld [vmem:[%s380_s1 + $0x34] sm:$0xf] }
   0x2   :  { %v226_v3 = vor.u32 %v263_v1, %v225_v0  ;;  %v227_v4 = vld [vmem:[%s380_s1 + $0x48] sm:$0xf0]  ;;  %v233_v5 = vld [vmem:[%s380_s1 + $0x38] sm:$0xf]  ;;  %v264_v6 = vld [vmem:[%s380_s1 + $0x4c] sm:$0xf0] }
   0x3   :  { %v230_v7 = vor.u32 %v260_v2, %v227_v4  ;;  %v234_v8 = vor.u32 %v264_v6, %v233_v5  ;;  %v261_v9 = vld [vmem:[%s380_s1 + $0x3c] sm:$0xf]  ;;  %v235_v10 = vld [vmem:[%s380_s1 + $0x50] sm:$0xf0]  ;;  %v201_v11 = vld [vmem:[%s380_s1] sm:$0xf] }
   0x4   :  { %101 = vmatpush.bf16.msra.mxu0 %v226_v3  ;;  %v238_v12 = vor.u32 %v261_v9, %v235_v10  ;;  %v257_v13 = vld [vmem:[%s380_s1 + $0x14] sm:$0xf0]  ;;  %v254_v14 = vld [vmem:[%s380_s1 + $0x4] sm:$0xf]  ;;  %v203_v15 = vld [vmem:[%s380_s1 + $0x18] sm:$0xf0] }
   0x5   :  { %115 = vmatpush.bf16.msra.mxu1 %v230_v7  ;;  %129 = vmatpush.bf16.msra.mxu2 %v234_v8  ;;  %v202_v16 = vor.u32 %v257_v13, %v201_v11  ;;  %v206_v17 = vor.u32 %v254_v14, %v203_v15  ;;  %v209_v18 = vld [vmem:[%s380_s1 + $0x8] sm:$0xf]  ;;  %v258_v19 = vld [vmem:[%s380_s1 + $0x1c] sm:$0xf0]  ;;  %v255_v20 = vld [vmem:[%s380_s1 + $0xc] sm:$0xf] }
   0x6   :  { %143 = vmatpush.bf16.msra.mxu3 %v238_v12  ;;  %v210_v21 = vor.u32 %v258_v19, %v209_v18  ;;  %v211_v22 = vld [vmem:[%s380_s1 + $0x20] sm:$0xf0]  ;;  %v241_v24 = vld [vmem:[%s380_s1 + $0x40] sm:$0xf]  ;;  %v265_v26 = vld [vmem:[%s380_s1 + $0x54] sm:$0xf0] }
   0x7   :  { %v253_v23 = vld [vmem:[%s381_s0] sm:$0xff]  ;;  %v214_v25 = vor.u32 %v255_v20, %v211_v22  ;;  %v243_v28 = vld [vmem:[%s380_s1 + $0x58] sm:$0xf0]  ;;  %v242_v29 = vor.u32 %v265_v26, %v241_v24  ;;  %v217_v31 = vld [vmem:[%s380_s1 + $0x10] sm:$0xf] }
   0x8   :  { %v262_v27 = vld [vmem:[%s380_s1 + $0x44] sm:$0xf]  ;;  %102 = vmatpush.bf16.msra.mxu0 %v202_v16  ;;  %v259_v32 = vld [vmem:[%s380_s1 + $0x24] sm:$0xf0]  ;;  %v256_v33 = vld [vmem:[%s380_s1 + $0x14] sm:$0xf] }
   0x9   :  { %v246_v30 = vor.u32 %v262_v27, %v243_v28  ;;  %116 = vmatpush.bf16.msra.mxu1 %v206_v17  ;;  %130 = vmatpush.bf16.msra.mxu2 %v210_v21  ;;  %v219_v34 = vld [vmem:[%s380_s1 + $0x28] sm:$0xf0]  ;;  %v218_v35 = vor.u32 %v259_v32, %v217_v31 }
   0xa   :  { %144 = vmatpush.bf16.msra.mxu3 %v214_v25  ;;  %v222_v36 = vor.u32 %v256_v33, %v219_v34 }
   0xb   :  { %247 = vmatmul.msk.bf16.vlgmr.msra.gmra.mxu0 %vm91_vm0, %v253_v23 }
   0xc   :  { %157 = vmatpush.bf16.msrb.mxu0 %v242_v29  ;;  %248 = vmatmul.msk.bf16.vlgmr.msra.gmra.mxu1 %vm91_vm0, %v253_v23 }
   0xd   :  { %171 = vmatpush.bf16.msrb.mxu1 %v246_v30  ;;  %249 = vmatmul.msk.bf16.vlgmr.msra.gmra.mxu2 %vm91_vm0, %v253_v23 }
   0xe   :  { %250 = vmatmul.msk.bf16.vlgmr.msra.gmra.mxu3 %vm91_vm0, %v253_v23 }
  0x10   :  { %158 = vmatpush.bf16.msrb.mxu0 %v218_v35 }
  0x11   :  { %172 = vmatpush.bf16.msrb.mxu1 %v222_v36 }
  0x1b   :  { %251 = vmatmul.msk.bf16.vlgmr.msrb.gmra.mxu0 %vm91_vm0, %v253_v23 }
  0x1c   :  { %252 = vmatmul.msk.bf16.vlgmr.msrb.gmra.mxu1 %vm91_vm0, %v253_v23 }
  0x88   :  { %v104_v37 = vpop.f32.mrf.mxu0 }
  0x89   :  { %v118_v38 = vpop.f32.mrf.mxu1 }
  0x8a   :  { %v179_v39 = vpack.c.bf16 %v118_v38, %v104_v37 }
  0x8c   :  { %185 = vst [vmem:[%s382_s2] sm:$0xff] %v179_v39 }
  0x90   :  { %v132_v40 = vpop.f32.mrf.mxu2  ;;  %v106_v41 = vpop.f32.mrf.mxu0 }
  0x91   :  { %v146_v42 = vpop.f32.mrf.mxu3  ;;  %v120_v43 = vpop.f32.mrf.mxu1 }
  0x92   :  { %v180_v44 = vpack.c.bf16 %v146_v42, %v132_v40  ;;  %v182_v45 = vpack.c.bf16 %v120_v43, %v106_v41 }
  0x94   :  { %186 = vst [vmem:[%s382_s2 + $0x8] sm:$0xff] %v180_v44 }
  0x95   :  { %188 = vst [vmem:[%s382_s2 + $0x18] sm:$0xff] %v182_v45 }
  0x98   :  { %v134_v46 = vpop.f32.mrf.mxu2  ;;  %v160_v48 = vpop.f32.mrf.mxu0 }
  0x99   :  { %v148_v47 = vpop.f32.mrf.mxu3  ;;  %v174_v50 = vpop.f32.mrf.mxu1 }
  0x9a   :  { %v183_v49 = vpack.c.bf16 %v148_v47, %v134_v46  ;;  %v181_v51 = vpack.c.bf16 %v174_v50, %v160_v48 }
  0x9c   :  { %189 = vst [vmem:[%s382_s2 + $0x20] sm:$0xff] %v183_v49 }
  0x9d   :  { %187 = vst [vmem:[%s382_s2 + $0x10] sm:$0xff] %v181_v51 }
  0xa0   :  { %v162_v52 = vpop.f32.mrf.mxu0 }
  0xa1   :  { %v176_v53 = vpop.f32.mrf.mxu1 }
  0xa2   :  { %v184_v54 = vpack.c.bf16 %v176_v53, %v162_v52 }
  0xa4   :  { %190 = vst [vmem:[%s382_s2 + $0x28] sm:$0xff] %v184_v54 }

// kernel: attention_forward.4
= control target key start
LH: loop header
LB: loop body
LE: loop exit
PB: predicated region body
PF: predicated region fallthrough
CT: control target
= control target key end

     0   :  { %s727_s12 = smov 0   ;;  %s729_s13 = smov 0   ;;  %s789_s0 = inlined_call_operand.vmem [shape: bf16[2,8,768], index: 0, kind: input, shape index: {}, may-alias: {0,1,2}]   ;;  %s790_s1 = inlined_call_operand.vmem [shape: bf16[2,8,768], index: 1, kind: input, shape index: {}, may-alias: {0,1,2}]   ;;  %s791_s2 = inlined_call_operand.vmem [shape: bf16[2,8,768], index: 2, kind: input, shape index: {}, may-alias: {0,1,2}]   ;;  %s792_s3 = inlined_call_operand.vmem [shape: bf16[2,8,256], index: 3, kind: output, shape index: {}]  }
   0x1   :  { %s731_s14 = smov 0  }
   0x2 LB: > { %s32_s15 = sadd.s32 1, %s698_s13  ;;  %p622_p0 = scmp.ge.s32.totalorder %s702_s14, 1  ;;  %s702_s14 = sphi %s731_s14, %s13_s14   ;;  %s698_s13 = sphi %s729_s13, %s794_s13   ;;  %s694_s12 = sphi %s727_s12, %s793_s12  }
   0x3   : > { %p34_p1 = scmp.ge.s32.totalorder %s32_s15, 2  ;;  %p198_p2 = scmp.lt.s32.totalorder %s702_s14, 3 }
   0x5   : > { %s796_s15 = smov (%p34_p1, %s32_s15), 0  ;;  %p199_p3 = pnand %p622_p0, %p198_p2 }
   0x6   : > { %p250_p4 = scmp.lt.s32.totalorder (!%p199_p3), %s694_s12, 1 }
   0x7   : > { %202 = sbr.rel (%p199_p3) target bundleno = 671 (0x29f), region = 32 }
   0xc   : > { %s798_s12 = smov (!%p250_p4, %s694_s12), 1  ;;  %vm293_vm0 = vcmask 7168   ;;  %v704_v9 = vmov -inf   ;;  %vm319_vm1 = vcmask 64512   ;;  %v705_v16 = vmov 0  }
   0xd   : > { %s748_s16 = smul.u32 24, %s798_s12  ;;  %295 = vst.msk [vmem:[#allocation2 + $0x8] sm:$0xff] %vm293_vm0, %v704_v9  ;;  %665 = vset.pattern.permute.xlu1 %v705_v16  ;;  %666 = vset.pattern.permute.xlu0 %v705_v16  ;;  %v706_v17 = vmov 0.0   ;;  %vm355_vm2 = vcmask 1043456   ;;  %s636_s26 = sshll.u32 %s798_s12, 3 }
   0xe   : > { %294 = vst.msk [vmem:[#allocation2] sm:$0xff] %vm293_vm0, %v704_v9  ;;  %667 = vset.pattern.permute.xlu2 %v705_v16  ;;  %s287_s29 = scalar_lea.vmem %s792_s3, %s636_s26 }
   0xf   : > { %s552_s19 = scalar_lea.vmem %s790_s1, %s748_s16  ;;  %s258_s22 = scalar_lea.vmem %s789_s0, %s748_s16  ;;  %296 = vst.msk [vmem:[#allocation3] sm:$0xff] %vm293_vm0, %v706_v17 }
  0x10   : > { %v631_v0 = vld [vmem:[%s552_s19 + $0xc] sm:$0xf]  ;;  %v628_v1 = vld [vmem:[%s552_s19 + $0x8] sm:$0xf]  ;;  %v375_v2 = vld [vmem:[%s258_s22] sm:$0xff]   ;;  %297 = vst.msk [vmem:[#allocation3 + $0x8] sm:$0xff] %vm293_vm0, %v706_v17  ;;  %s558_s25 = scalar_lea.vmem %s791_s2, %s748_s16 }
  0x11   : > { %387 = vmatpush.bf16.xpose.msra.mxu2 %v631_v0  ;;  %312 = vmatpush.bf16.xpose.msra.mxu0 %v628_v1  ;;  %v376_v3 = vunpack.c.h.bf16 %v375_v2  ;;  %v301_v4 = vunpack.c.l.bf16 %v375_v2  ;;  %v632_v30 = vld [vmem:[%s558_s25 + $0x14] sm:$0xf]  ;;  %v629_v32 = vld [vmem:[%s558_s25 + $0x10] sm:$0xf] }
  0x12   : > { %v432_v31 = vsel %vm355_vm2, %v632_v30, 0  ;;  %v357_v33 = vsel %vm355_vm2, %v629_v32, 0 }
  0x13   : > { %v377_v5 = vmul.f32 0.088378906, %v376_v3  ;;  %v302_v6 = vmul.f32 0.088378906, %v301_v4  ;;  %441 = vmatpush.bf16.msra.mxu3 %v432_v31  ;;  %366 = vmatpush.bf16.msra.mxu1 %v357_v33 }
  0x14   : > { %v394_v18 = vld [vmem:[#allocation2 + $0x8] sm:$0xff] }
  0x15   : > { %v378_v7 = vpack.c.bf16 %v377_v5, %v377_v5  ;;  %v303_v8 = vpack.c.bf16 %v302_v6, %v302_v6  ;;  %v318_v22 = vld [vmem:[#allocation2] sm:$0xff] }
  0x16   : > { %v335_v46 = vld [vmem:[#allocation3] sm:$0xff] }
  0x17   : > { %v411_v50 = vld [vmem:[#allocation3 + $0x8] sm:$0xff] }
  0x18   : > { %388 = vmatmul.bf16.vlgmr.msra.gmra.mxu2 %v378_v7  ;;  %313 = vmatmul.bf16.vlgmr.msra.gmra.mxu0 %v303_v8 }
  0x95   : > { %v314_v10 = vpop.f32.mrf.mxu0 }
  0x96   : > { %v320_v14 = vsel %vm319_vm1, %v314_v10, -inf }
  0x9b   : > { %v389_v11 = vpop.f32.mrf.mxu2 }
  0x9c   : > { %v395_v12 = vsel %vm319_vm1, %v389_v11, -inf }
  0x9d   : > { %396 = vmax.xlane.f32.xlu0 %v395_v12  ;;  %v316_v13 = vpop.f32.mrf.mxu0 }
  0xa3   : > { %v391_v15 = vpop.f32.mrf.mxu2 }
  0xa5   : > { %321 = vmax.xlane.f32.xlu0 %v320_v14 }
 0x110   : > { %v397_v19 = vpop.xlane.xlu0 %396 }
 0x111   : > { %v398_v20 = vmax.f32 %v394_v18, %v397_v19 }
 0x113   : > { %449 = vst.msk [vmem:[#allocation2 + $0x8] sm:$0xff] %vm293_vm0, %v398_v20  ;;  %404 = vperm.xlu1 %665, %v398_v20   ;;  %v399_v21 = vsub.f32 %v394_v18, %v398_v20 }
 0x115   : > { %v400_v23 = vmul.f32 1.442695, %v399_v21 }
 0x117   : > { %668 = vpow2.f32 %v400_v23 }
 0x118   : > { %v322_v24 = vpop.xlane.xlu0 %321 }
 0x119   : > { %v323_v25 = vmax.f32 %v318_v22, %v322_v24 }
 0x11b   : > { %v324_v26 = vsub.f32 %v318_v22, %v323_v25  ;;  %374 = vst.msk [vmem:[#allocation2] sm:$0xff] %vm293_vm0, %v323_v25  ;;  %329 = vperm.xlu1 %665, %v323_v25  }
 0x11d   : > { %v325_v27 = vmul.f32 1.442695, %v324_v26  ;;  %v669_v28 = vpop.eup %668 }
 0x11e   : > { %v412_v51 = vmul.f32 %v669_v28, %v411_v50 }
 0x11f   : > { %670 = vpow2.f32 %v325_v27 }
 0x123   : > { %422 = vperm.xlu1 %665, %v669_v28  }
 0x125   : > { %v671_v29 = vpop.eup %670 }
 0x126   : > { %346 = vperm.xlu0 %666, %v671_v29   ;;  %v336_v47 = vmul.f32 %v671_v29, %v335_v46 }
 0x185   : > { %v405_v34 = vpop.permute.xlu1 %404 }
 0x186   : > { %v407_v35 = vsub.f32 %v389_v11, %v405_v34 }
 0x188   : > { %v408_v36 = vmul.f32 1.442695, %v407_v35 }
 0x18a   : > { %672 = vpow2.f32 %v408_v36 }
 0x18d   : > { %v330_v37 = vpop.permute.xlu1 %329 }
 0x18e   : > { %v332_v38 = vsub.f32 %v314_v10, %v330_v37 }
 0x190   : > { %v673_v39 = vpop.eup %672  ;;  %v333_v40 = vmul.f32 1.442695, %v332_v38 }
 0x191   : > { %v426_v41 = vpack.c.bf16 %v673_v39, %v673_v39  ;;  %v413_v45 = vsel %vm319_vm1, %v673_v39, 0.0 }
 0x192   : > { %674 = vpow2.f32 %v333_v40 }
 0x193   : > { %633 = vmatmul.msk.bf16.vlgmr.msra.gmra.mxu3 %vm319_vm1, %v426_v41 }
 0x195   : > { %v423_v4 = vpop.permute.xlu1 %422 }
 0x196   : > { %v425_v5 = vmul.f32 0.0, %v423_v4 }
 0x198   : > { %v675_v42 = vpop.eup %674  ;;  %v347_v62 = vpop.permute.xlu0 %346 }
 0x199   : > { %v337_v43 = vsel %vm319_vm1, %v675_v42, 0.0  ;;  %v350_v44 = vpack.c.bf16 %v675_v42, %v675_v42  ;;  %v349_v63 = vmul.f32 0.0, %v347_v62 }
 0x19a   : > { %338 = vadd.xlane.f32.xlu2 %v337_v43 }
 0x19b   : > { %630 = vmatmul.msk.bf16.vlgmr.msra.gmra.mxu1 %vm319_vm1, %v350_v44 }
 0x1a2   : > { %414 = vadd.xlane.f32.xlu2 %v413_v45 }
 0x20d   : > { %v339_v48 = vpop.xlane.xlu2 %338 }
 0x20e   : > { %v340_v49 = vadd.f32 %v339_v48, %v336_v47 }
 0x210   : > { %342 = vst.msk [vmem:[#allocation3] sm:$0xff] %vm293_vm0, %v340_v49 }
 0x215   : > { %v415_v52 = vpop.xlane.xlu2 %414 }
 0x216   : > { %v416_v53 = vadd.f32 %v415_v52, %v412_v51  ;;  %v443_v54 = vpop.f32.mrf.mxu3 }
 0x217   : > { %v453_v55 = vld [vmem:[#allocation3] sm:$0xff]  ;;  %v447_v6 = vadd.f32 %v443_v54, %v425_v5 }
 0x218   : > { %417 = vst.msk [vmem:[#allocation3 + $0x8] sm:$0xff] %vm293_vm0, %v416_v53  ;;  %v368_v56 = vpop.f32.mrf.mxu1  ;;  %676 = vrcp.f32 %v453_v55 }
 0x219   : > { %v372_v0 = vadd.f32 %v368_v56, %v349_v63 }
 0x21e   : > { %v677_v57 = vpop.eup %676  ;;  %v445_v58 = vpop.f32.mrf.mxu3 }
 0x21f   : > { %458 = vperm.xlu2 %667, %v677_v57   ;;  %v464_v59 = vld [vmem:[#allocation3 + $0x8] sm:$0xff] }
 0x220   : > { %v370_v60 = vpop.f32.mrf.mxu1  ;;  %678 = vrcp.f32 %v464_v59 }
 0x226   : > { %v679_v61 = vpop.eup %678 }
 0x227   : > { %469 = vperm.xlu1 %665, %v679_v61  }
 0x279   : > { %v459_v1 = vpop.permute.xlu2 %458 }
 0x27a   : > { %v461_v2 = vmul.f32 %v459_v1, %v372_v0 }
 0x27c   : > { %v462_v3 = vpack.c.bf16 %v461_v2, %v461_v2 }
 0x27e   : > { %463 = vst [vmem:[%s287_s29] sm:$0xf] %v462_v3 }
 0x299   : > { %v470_v7 = vpop.permute.xlu1 %469 }
 0x29a   : > { %v472_v8 = vmul.f32 %v470_v7, %v447_v6 }
 0x29c   : > { %v473_v9 = vpack.c.bf16 %v472_v8, %v472_v8 }
 0x29e   : > { %474 = vst [vmem:[%s287_s29 + $0x4] sm:$0xf] %v473_v9 }
 0x29f PF: > { %s13_s14 = sadd.s32 1, %s702_s14   ;;  %s793_s12 = smov %s698_s13 }
 0x2a0   : > { %p10_p5 = scmp.ge.s32.totalorder %s13_s14, 4   ;;  %s794_s13 = smov %s796_s15 }
 0x2a2   :  { %12 = sbr.rel (!%p10_p5) target bundleno = 2 (0x2), region = 79 }

</bundles_post_ra>
